<compile_context>
chip_gen: v6e
topology: v6e:2x2x1
jax: 0.10.0
libtpu: 0.0.40
codegen_flags: <defaults>
</compile_context>

<pallas_src>
import functools

import numpy as np
import jax
import jax.numpy as jnp
from jax.experimental import pallas as pl
from jax.experimental.pallas import tpu as pltpu


def _round_up(x: int, m: int) -> int:
    return ((x + m - 1) // m) * m


def _indicator_matrices():
    """0/1 structure matrices for the flattened (729,) board layout.

    feature index f = c*81 + j   (c = digit channel, j = h*9 + w cell index)
      C  (729,  81): per-cell candidate count         s0  = x  @ C
      CT ( 81, 729): broadcast per-cell -> feature    u_t = u  @ CT
      G  (729, 243): per-digit row/col/box group sums gs  = m1 @ G
                     (columns c*27 + {h, 9 + w, 18 + box})
    """
    f = np.arange(729)
    c = f // 81
    j = f % 81
    h = j // 9
    w = j % 9
    box = (h // 3) * 3 + (w // 3)

    C = (j[:, None] == np.arange(81)[None, :]).astype(np.float32)
    G = np.zeros((729, 243), dtype=np.float32)
    G[f, c * 27 + h] = 1.0
    G[f, c * 27 + 9 + w] = 1.0
    G[f, c * 27 + 18 + box] = 1.0
    bf = jnp.bfloat16
    return (jnp.asarray(C, dtype=bf),
            jnp.asarray(C.T.copy(), dtype=bf),
            jnp.asarray(G, dtype=bf))


def _sudoku_solved_kernel(x_ref, c_ref, ct_ref, g_ref, out_ref):
    """x_ref: (nb, 729) boards. c/ct/g_ref: resident 0/1 matrices. out_ref: (nb, 2)."""
    f32 = jnp.float32
    bf16 = jnp.bfloat16

    xv = x_ref[...]                          # single full-tile load (no channel slices)
    x = xv.astype(f32)
    xb = xv.astype(bf16)                     # exact for a {0,1} candidate mask

    # per-cell candidate count: s0[b, j] = sum_c mask[b, c, j]  (1x1 all-ones conv)
    s0 = jnp.dot(xb, c_ref[...], preferred_element_type=f32)            # (nb, 81)

    # determine_mask = NNCompare(s0, 1); zeros_mask = NNCompare(s0, 0)
    uniq = jnp.minimum(jnp.maximum(s0, 0.0), jnp.maximum(2.0 - s0, 0.0))
    zeros = jnp.minimum(jnp.maximum(s0 + 1.0, 0.0), jnp.maximum(1.0 - s0, 0.0))

    # determine_sum = 9x9 all-ones conv; all_cells_resolved = NNCompare(., 81)
    det_sum = jnp.sum(uniq, axis=1, keepdims=True)                      # (nb, 1)
    all_cells = jnp.minimum(jnp.maximum(det_sum - 80.0, 0.0),
                            jnp.maximum(82.0 - det_sum, 0.0))
    zmax = jnp.max(zeros, axis=1, keepdims=True)                        # 9x9 max-pool

    # broadcast determine_mask to all 9 digit channels (nb, 729), on the MXU.
    uniq_t = jnp.dot(uniq.astype(bf16), ct_ref[...], preferred_element_type=f32)

    # NNAnd(mask, determine_mask); uniq_t <= 1 so the upper clamp is redundant.
    m1 = jnp.maximum(jnp.minimum(x, uniq_t), 0.0)

    # per-digit row / column / box sums: ONE fused MXU matmul -> (nb, 243).
    gs = jnp.dot(m1.astype(bf16), g_ref[...], preferred_element_type=f32)
    viol = jnp.max(jnp.maximum(gs - 1.0, 0.0), axis=1, keepdims=True)   # (nb, 1)

    # NNOr chain of h/v/box violations; operands >= 0 so only the upper clamp remains.
    iri = jnp.minimum(viol, 1.0)
    inv = jnp.maximum(zmax, iri)                 # NNOr(zeros_max, iri), both in [0,1]
    res = jnp.minimum(all_cells, 1.0 - iri)      # NNAnd(all_cells, NNNot(iri))

    out_ref[...] = jnp.concatenate([res, inv], axis=1).astype(out_ref.dtype)


@functools.partial(jax.jit, static_argnames=("block_boards",))
def sudoku_solved(mask: jax.Array, *, block_boards: int = 512):
    """Pallas implementation of SudokuSolved.forward. Returns (is_resolved, is_invalid)."""
    N, C, H, W = mask.shape
    assert (C, H, W) == (9, 9, 9), "expects a 9x9 sudoku candidate mask (NCHW)"

    # Lane-dense layout: flatten each board to 729 lanes (free reshape of NCHW).
    x = mask.reshape(N, 729)

    # Boards per grid step: multiple of 8; keep >= 2 grid blocks when possible so
    # the "parallel" batch axis feeds both v7x TensorCores.
    nb = int(block_boards)
    nb = min(nb, _round_up(pl.cdiv(N, 2), 8))
    nb = max(8, _round_up(nb, 8))
    grid = pl.cdiv(N, nb)                      # ragged last block; no wrapper pad

    c_mat, ct_mat, g_mat = _indicator_matrices()

    out = pl.pallas_call(
        _sudoku_solved_kernel,
        out_shape=jax.ShapeDtypeStruct((N, 2), mask.dtype),
        grid_spec=pltpu.PrefetchScalarGridSpec(
            num_scalar_prefetch=0,
            grid=(grid,),
            in_specs=[
                pl.BlockSpec((nb, 729), lambda i: (i, 0)),
                # constant block indices -> DMA'd once, stay VMEM-resident
                pl.BlockSpec((729, 81), lambda i: (0, 0)),
                pl.BlockSpec((81, 729), lambda i: (0, 0)),
                pl.BlockSpec((729, 243), lambda i: (0, 0)),
            ],
            out_specs=pl.BlockSpec((nb, 2), lambda i: (i, 0)),
        ),
        compiler_params=pltpu.CompilerParams(
            dimension_semantics=("parallel",),
            vmem_limit_bytes=32 * 1024 * 1024),
    )(x, c_mat, ct_mat, g_mat)
    return out[:, 0], out[:, 1]


# ----------------------------- reference & test ------------------------------

def _nn_compare_np(x, v):
    return np.minimum(np.maximum(x - v + 1.0, 0.0), np.maximum(v + 1.0 - x, 0.0))


def _reference(mask: np.ndarray):
    """Pure NumPy replica of the PyTorch SudokuSolved.forward."""
    mask = np.asarray(mask, dtype=np.float32)
    N = mask.shape[0]
    s0 = mask.sum(axis=1, keepdims=True)                           # (N,1,9,9)
    determine_mask = _nn_compare_np(s0, 1.0)
    determine_sum = determine_mask.sum(axis=(2, 3))                # (N,1)
    all_cells_resolved = _nn_compare_np(determine_sum, 81.0).reshape(N)
    zeros_mask = _nn_compare_np(s0, 0.0)
    is_invalid = zeros_mask.max(axis=(2, 3)).reshape(N)
    m1 = np.clip(np.minimum(mask, determine_mask), 0.0, 1.0)       # NNAnd
    row = m1.sum(axis=3)                                           # (N,9,9)
    col = m1.sum(axis=2)                                           # (N,9,9)
    box = m1.reshape(N, 9, 3, 3, 3, 3).sum(axis=(3, 5))            # (N,9,3,3)
    mh = np.maximum(row - 1.0, 0.0).max(axis=(1, 2))
    mv = np.maximum(col - 1.0, 0.0).max(axis=(1, 2))
    mb = np.maximum(box - 1.0, 0.0).max(axis=(1, 2, 3))
    iri = np.clip(np.maximum(np.clip(np.maximum(mh, mv), 0.0, 1.0), mb), 0.0, 1.0)
    is_invalid = np.clip(np.maximum(is_invalid, iri), 0.0, 1.0)
    is_resolved = np.clip(np.minimum(all_cells_resolved, 1.0 - iri), 0.0, 1.0)
    return is_resolved, is_invalid


def _solved_board() -> np.ndarray:
    """A valid fully-solved sudoku as a (9,9,9) one-hot candidate mask."""
    b = np.zeros((9, 9, 9), dtype=np.float32)
    for h in range(9):
        for w in range(9):
            d = (h * 3 + h // 3 + w) % 9
            b[d, h, w] = 1.0
    return b


if __name__ == "__main__":
    key = jax.random.PRNGKey(0)
    key_a, key_b = jax.random.split(key)

    # Small, deterministic batch: random board, valid solved board,
    # board with an empty cell (invalid), board with a duplicated digit (invalid).
    rand = np.asarray(
        jax.random.bernoulli(key_a, p=0.3, shape=(1, 9, 9, 9))).astype(np.float32)
    solved = _solved_board()
    empty_cell = solved.copy()
    empty_cell[:, 0, 0] = 0.0
    dup = solved.copy()
    d00 = int(np.argmax(solved[:, 0, 0]))
    dup[:, 0, 1] = 0.0
    dup[d00, 0, 1] = 1.0
    mask = jnp.asarray(np.concatenate([rand, np.stack([solved, empty_cell, dup])], axis=0))

    res, inv = sudoku_solved(mask)
    res, inv = jax.block_until_ready((res, inv))
    ref_res, ref_inv = _reference(np.asarray(mask))
    np.testing.assert_allclose(np.asarray(res), ref_res, rtol=1e-5, atol=1e-5)
    np.testing.assert_allclose(np.asarray(inv), ref_inv, rtol=1e-5, atol=1e-5)
    assert abs(float(res[1]) - 1.0) < 1e-5 and abs(float(inv[1])) < 1e-5
    assert abs(float(inv[2]) - 1.0) < 1e-5
    assert abs(float(inv[3]) - 1.0) < 1e-5 and abs(float(res[3])) < 1e-5

    # Larger batch exercising the ragged last block and multiple grid steps.
    mask_big = jax.random.bernoulli(key_b, p=0.3, shape=(37, 9, 9, 9)).astype(jnp.float32)
    res_b, inv_b = sudoku_solved(mask_big, block_boards=16)
    res_b, inv_b = jax.block_until_ready((res_b, inv_b))
    ref_res_b, ref_inv_b = _reference(np.asarray(mask_big))
    np.testing.assert_allclose(np.asarray(res_b), ref_res_b, rtol=1e-5, atol=1e-5)
    np.testing.assert_allclose(np.asarray(inv_b), ref_inv_b, rtol=1e-5, atol=1e-5)

    print("KERNEL_OK")
</pallas_src>

<mosaic_0001>
module attributes {stable_mosaic.version = 11 : i64} {
  func.func @_sudoku_solved_kernel(%arg0: i32, %arg1: memref<8x729xf32, #tpu.memory_space<vmem>>, %arg2: memref<729x81xbf16, #tpu.memory_space<vmem>>, %arg3: memref<81x729xbf16, #tpu.memory_space<vmem>>, %arg4: memref<729x243xbf16, #tpu.memory_space<vmem>>, %arg5: memref<8x2xf32, #tpu.memory_space<vmem>>) attributes {dimension_semantics = [#tpu.dimension_semantics<parallel>], iteration_bounds = array<i64: 1>, scalar_prefetch = 0 : i64, scratch_operands = 0 : i64, tpu.core_type = #tpu.core_type<tc>, window_params = [{transform_indices = @transform_0, window_bounds = array<i64: 8, 729>}, {pipeline_mode = #tpu.pipeline_mode<synchronous>, transform_indices = @transform_1, window_bounds = array<i64: 729, 81>}, {pipeline_mode = #tpu.pipeline_mode<synchronous>, transform_indices = @transform_2, window_bounds = array<i64: 81, 729>}, {pipeline_mode = #tpu.pipeline_mode<synchronous>, transform_indices = @transform_3, window_bounds = array<i64: 729, 243>}, {transform_indices = @transform_4, window_bounds = array<i64: 8, 2>}]} {
    %c0 = arith.constant 0 : index
    %c0_0 = arith.constant 0 : index
    %0 = vector.load %arg1[%c0, %c0_0] : memref<8x729xf32, #tpu.memory_space<vmem>>, vector<8x729xf32>
    %1 = arith.truncf %0 : vector<8x729xf32> to vector<8x729xbf16>
    %c0_1 = arith.constant 0 : index
    %c0_2 = arith.constant 0 : index
    %2 = vector.load %arg2[%c0_1, %c0_2] : memref<729x81xbf16, #tpu.memory_space<vmem>>, vector<729x81xbf16>
    %cst = arith.constant dense<0.000000e+00> : vector<8x81xf32>
    %3 = tpu.matmul %1, %2, %cst {dimension_numbers = #tpu.dot_dimension_numbers<[1], [0], [0], [1], [0, 0, 1, 1], [], []>} : vector<8x729xbf16>, vector<729x81xbf16>, vector<8x81xf32> -> vector<8x81xf32>
    %cst_3 = arith.constant 0.000000e+00 : f32
    %4 = vector.broadcast %cst_3 : f32 to vector<8x81xf32>
    %5 = arith.maximumf %3, %4 : vector<8x81xf32>
    %cst_4 = arith.constant 2.000000e+00 : f32
    %6 = vector.broadcast %cst_4 : f32 to vector<8x81xf32>
    %7 = arith.subf %6, %3 : vector<8x81xf32>
    %cst_5 = arith.constant 0.000000e+00 : f32
    %8 = vector.broadcast %cst_5 : f32 to vector<8x81xf32>
    %9 = arith.maximumf %7, %8 : vector<8x81xf32>
    %10 = arith.minimumf %5, %9 : vector<8x81xf32>
    %cst_6 = arith.constant 1.000000e+00 : f32
    %11 = vector.broadcast %cst_6 : f32 to vector<8x81xf32>
    %12 = arith.addf %3, %11 : vector<8x81xf32>
    %cst_7 = arith.constant 0.000000e+00 : f32
    %13 = vector.broadcast %cst_7 : f32 to vector<8x81xf32>
    %14 = arith.maximumf %12, %13 : vector<8x81xf32>
    %cst_8 = arith.constant 1.000000e+00 : f32
    %15 = vector.broadcast %cst_8 : f32 to vector<8x81xf32>
    %16 = arith.subf %15, %3 : vector<8x81xf32>
    %cst_9 = arith.constant 0.000000e+00 : f32
    %17 = vector.broadcast %cst_9 : f32 to vector<8x81xf32>
    %18 = arith.maximumf %16, %17 : vector<8x81xf32>
    %19 = arith.minimumf %14, %18 : vector<8x81xf32>
    %cst_10 = arith.constant dense<0.000000e+00> : vector<8xf32>
    %20 = vector.multi_reduction <add>, %10, %cst_10 [1] : vector<8x81xf32> to vector<8xf32>
    %21 = vector.shape_cast %20 : vector<8xf32> to vector<8x1xf32>
    %cst_11 = arith.constant 8.000000e+01 : f32
    %22 = vector.broadcast %cst_11 : f32 to vector<8x1xf32>
    %23 = arith.subf %21, %22 : vector<8x1xf32>
    %cst_12 = arith.constant 0.000000e+00 : f32
    %24 = vector.broadcast %cst_12 : f32 to vector<8x1xf32>
    %25 = arith.maximumf %23, %24 : vector<8x1xf32>
    %cst_13 = arith.constant 8.200000e+01 : f32
    %26 = vector.broadcast %cst_13 : f32 to vector<8x1xf32>
    %27 = arith.subf %26, %21 : vector<8x1xf32>
    %cst_14 = arith.constant 0.000000e+00 : f32
    %28 = vector.broadcast %cst_14 : f32 to vector<8x1xf32>
    %29 = arith.maximumf %27, %28 : vector<8x1xf32>
    %30 = arith.minimumf %25, %29 : vector<8x1xf32>
    %cst_15 = arith.constant dense<0xFF800000> : vector<8xf32>
    %31 = vector.multi_reduction <maximumf>, %19, %cst_15 [1] : vector<8x81xf32> to vector<8xf32>
    %32 = vector.shape_cast %31 : vector<8xf32> to vector<8x1xf32>
    %33 = arith.truncf %10 : vector<8x81xf32> to vector<8x81xbf16>
    %c0_16 = arith.constant 0 : index
    %c0_17 = arith.constant 0 : index
    %34 = vector.load %arg3[%c0_16, %c0_17] : memref<81x729xbf16, #tpu.memory_space<vmem>>, vector<81x729xbf16>
    %cst_18 = arith.constant dense<0.000000e+00> : vector<8x729xf32>
    %35 = tpu.matmul %33, %34, %cst_18 {dimension_numbers = #tpu.dot_dimension_numbers<[1], [0], [0], [1], [0, 0, 1, 1], [], []>} : vector<8x81xbf16>, vector<81x729xbf16>, vector<8x729xf32> -> vector<8x729xf32>
    %36 = arith.minimumf %0, %35 : vector<8x729xf32>
    %cst_19 = arith.constant 0.000000e+00 : f32
    %37 = vector.broadcast %cst_19 : f32 to vector<8x729xf32>
    %38 = arith.maximumf %36, %37 : vector<8x729xf32>
    %39 = arith.truncf %38 : vector<8x729xf32> to vector<8x729xbf16>
    %c0_20 = arith.constant 0 : index
    %c0_21 = arith.constant 0 : index
    %40 = vector.load %arg4[%c0_20, %c0_21] : memref<729x243xbf16, #tpu.memory_space<vmem>>, vector<729x243xbf16>
    %cst_22 = arith.constant dense<0.000000e+00> : vector<8x243xf32>
    %41 = tpu.matmul %39, %40, %cst_22 {dimension_numbers = #tpu.dot_dimension_numbers<[1], [0], [0], [1], [0, 0, 1, 1], [], []>} : vector<8x729xbf16>, vector<729x243xbf16>, vector<8x243xf32> -> vector<8x243xf32>
    %cst_23 = arith.constant 1.000000e+00 : f32
    %42 = vector.broadcast %cst_23 : f32 to vector<8x243xf32>
    %43 = arith.subf %41, %42 : vector<8x243xf32>
    %cst_24 = arith.constant 0.000000e+00 : f32
    %44 = vector.broadcast %cst_24 : f32 to vector<8x243xf32>
    %45 = arith.maximumf %43, %44 : vector<8x243xf32>
    %cst_25 = arith.constant dense<0xFF800000> : vector<8xf32>
    %46 = vector.multi_reduction <maximumf>, %45, %cst_25 [1] : vector<8x243xf32> to vector<8xf32>
    %47 = vector.shape_cast %46 : vector<8xf32> to vector<8x1xf32>
    %cst_26 = arith.constant 1.000000e+00 : f32
    %48 = vector.broadcast %cst_26 : f32 to vector<8x1xf32>
    %49 = arith.minimumf %47, %48 : vector<8x1xf32>
    %50 = arith.maximumf %32, %49 : vector<8x1xf32>
    %cst_27 = arith.constant 1.000000e+00 : f32
    %51 = vector.broadcast %cst_27 : f32 to vector<8x1xf32>
    %52 = arith.subf %51, %49 : vector<8x1xf32>
    %53 = arith.minimumf %30, %52 : vector<8x1xf32>
    %54 = tpu.concatenate %53, %50 in 1 : vector<8x1xf32>, vector<8x1xf32> -> vector<8x2xf32>
    %c0_28 = arith.constant 0 : index
    %c0_29 = arith.constant 0 : index
    %55 = vector.load %arg5[%c0_28, %c0_29] : memref<8x2xf32, #tpu.memory_space<vmem>>, vector<8x2xf32>
    tpu.vector_store %arg5[%c0_28, %c0_29], %54 {strides = array<i32>} : memref<8x2xf32, #tpu.memory_space<vmem>>, vector<8x2xf32>,
    return
  }
  func.func @transform_0(%arg0: i32) -> (i32, i32) {
    %c0_i32 = arith.constant 0 : i32
    %c0_i32_0 = arith.constant 0 : i32
    return %arg0, %c0_i32 : i32, i32
  }
  func.func @transform_1(%arg0: i32) -> (i32, i32) {
    %c0_i32 = arith.constant 0 : i32
    %c0_i32_0 = arith.constant 0 : i32
    %c0_i32_1 = arith.constant 0 : i32
    return %c0_i32, %c0_i32_0 : i32, i32
  }
  func.func @transform_2(%arg0: i32) -> (i32, i32) {
    %c0_i32 = arith.constant 0 : i32
    %c0_i32_0 = arith.constant 0 : i32
    %c0_i32_1 = arith.constant 0 : i32
    return %c0_i32, %c0_i32_0 : i32, i32
  }
  func.func @transform_3(%arg0: i32) -> (i32, i32) {
    %c0_i32 = arith.constant 0 : i32
    %c0_i32_0 = arith.constant 0 : i32
    %c0_i32_1 = arith.constant 0 : i32
    return %c0_i32, %c0_i32_0 : i32, i32
  }
  func.func @transform_4(%arg0: i32) -> (i32, i32) {
    %c0_i32 = arith.constant 0 : i32
    %c0_i32_0 = arith.constant 0 : i32
    return %arg0, %c0_i32 : i32, i32
  }
}

</mosaic_0001>

<bundles_post_ra>
// kernel: sudoku_solved.1
= control target key start
LH: loop header
LB: loop body
LE: loop exit
PB: predicated region body
PF: predicated region fallthrough
CT: control target
= control target key end

     0   :  { %v2178_v2 = vmov 0   ;;  %vm419_vm0 = vcmask 1043456   ;;  %vm420_vm1 = vcmask 1044480   ;;  %v2179_v33 = vmov 65535   ;;  %s2808_s0 = inlined_call_operand.vmem [shape: f32[4,729], index: 0, kind: input, shape index: {}]   ;;  %s2809_s1 = inlined_call_operand.vmem [shape: bf16[729,81], index: 1, kind: input, shape index: {}]   ;;  %s2810_s2 = inlined_call_operand.vmem [shape: bf16[81,729], index: 2, kind: input, shape index: {}]   ;;  %s2811_s3 = inlined_call_operand.vmem [shape: bf16[729,243], index: 3, kind: input, shape index: {}]   ;;  %s2812_s4 = inlined_call_operand.vmem [shape: f32[4,2], index: 4, kind: output, shape index: {}]  }
   0x1   :  { %v1935_v0 = vld [vmem:[%s2809_s1 + $0x78] sm:$0xff]   ;;  %506 = vmatprep.subr.bf16.mxu0 %v2178_v2  ;;  %v1937_v3 = vld [vmem:[%s2809_s1 + $0x70] sm:$0xff]   ;;  %v1939_v5 = vld [vmem:[%s2809_s1 + $0x68] sm:$0xff]   ;;  %v421_v34 = vsel %vm419_vm0, 4294967295, %v2179_v33  ;;  %vm415_vm2 = vcmask 728064   ;;  %vm769_vm3 = vcmask 1040384  }
   0x2   :  { %v1936_v1 = vld [vmem:[%s2809_s1 + $0x38] sm:$0xff]   ;;  %1889 = vmatprep.subr.bf16.mxu1 %v1935_v0  ;;  %v1938_v4 = vld [vmem:[%s2809_s1 + $0x30] sm:$0xff]   ;;  %v1940_v7 = vld [vmem:[%s2809_s1 + $0x28] sm:$0xff]   ;;  %v2303_v37 = vsel %vm420_vm1, %v421_v34, 0  ;;  %vm555_vm4 = vcmask 662528   ;;  %vm1653_vm5 = vcmask 941056  }
   0x3   :  { %1890 = vmatpush3.bf16.msra.mxu1 %v1936_v1  ;;  %v1941_v6 = vld [vmem:[%s2809_s1 + $0x138] sm:$0xff]   ;;  %v1942_v8 = vld [vmem:[%s2809_s1 + $0x60] sm:$0xff]   ;;  %v1944_v9 = vld [vmem:[%s2809_s1 + $0x130] sm:$0xff]   ;;  %vm1662_vm6 = vcmask 7168   ;;  %vm1664_vm7 = vcmask 15360  }
   0x4   :  { %1891 = vmatprep.subr.bf16.mxu1 %v1937_v3  ;;  %507 = vmatpush1.bf16.msra.mxu0 %v1941_v6  ;;  %v1943_v10 = vld [vmem:[%s2809_s1 + $0x20] sm:$0xff]   ;;  %v1945_v11 = vld [vmem:[%s2809_s1 + $0x58] sm:$0xff]   ;;  %v1947_v12 = vld [vmem:[%s2809_s1 + $0x128] sm:$0xff]  }
   0x5   :  { %508 = vmatprep.subr.bf16.mxu0 %v2178_v2  ;;  %v1946_v13 = vld [vmem:[%s2809_s1 + $0x18] sm:$0xff]   ;;  %v1948_v14 = vld [vmem:[%s2809_s1 + $0x50] sm:$0xff]   ;;  %v1950_v15 = vld [vmem:[%s2809_s1 + $0x120] sm:$0xff]  }
   0x6   :  { %v1949_v16 = vld [vmem:[%s2809_s1 + $0x10] sm:$0xff]   ;;  %v1951_v17 = vld [vmem:[%s2809_s1 + $0x48] sm:$0xff]   ;;  %v1953_v18 = vld [vmem:[%s2809_s1 + $0x118] sm:$0xff]  }
   0x7   :  { %1892 = vmatpush3.bf16.msra.mxu1 %v1938_v4  ;;  %v1952_v19 = vld [vmem:[%s2809_s1 + $0x8] sm:$0xff]   ;;  %v18_v20 = vld [vmem:[%s2808_s0] sm:$0xff]  ;;  %v21_v21 = vld [vmem:[%s2808_s0 + $0x18] sm:$0xff] }
   0x8   :  { %1893 = vmatprep.subr.bf16.mxu1 %v1939_v5  ;;  %509 = vmatpush1.bf16.msra.mxu0 %v1944_v9  ;;  %v1954_v22 = vld [vmem:[%s2809_s1 + $0x40] sm:$0xff]   ;;  %v31_v23 = vcombine.high %v18_v20, %v21_v21  ;;  %v1956_v24 = vld [vmem:[%s2809_s1 + $0x110] sm:$0xff]   ;;  %v30_v27 = vcombine.low %v18_v20, %v21_v21  ;;  %v1959_v28 = vld [vmem:[%s2809_s1 + $0xf8] sm:$0xff]   ;;  %v2400_v9 = vsel %vm769_vm3, 65535, %v2178_v2 }
   0x9   :  { %510 = vmatprep.subr.bf16.mxu0 %v2178_v2  ;;  %v1955_v26 = vld [vmem:[%s2809_s1] sm:$0xff]   ;;  %v1961_v29 = vld [vmem:[%s2809_s1 + $0x108] sm:$0xff]   ;;  %v1960_v30 = vld [vmem:[%s2809_s1 + $0xb8] sm:$0xff]  }
   0xa   :  { %v43_v25 = vpack.c.bf16 %v31_v23, %v31_v23  ;;  %v42_v31 = vpack.c.bf16 %v30_v27, %v30_v27  ;;  %v1962_v32 = vld [vmem:[%s2809_s1 + $0xf0] sm:$0xff]   ;;  %v1964_v35 = vld [vmem:[%s2809_s1 + $0x100] sm:$0xff]   ;;  %v1967_v36 = vld [vmem:[%s2809_s1 + $0x168] sm:$0x1f]  }
   0xb   :  { %1894 = vmatpush3.bf16.msra.mxu1 %v1940_v7  ;;  %v1963_v38 = vld [vmem:[%s2809_s1 + $0xb0] sm:$0xff]   ;;  %v1965_v39 = vld [vmem:[%s2809_s1 + $0xe8] sm:$0xff]   ;;  %v424_v40 = vand.u32 %v1967_v36, %v2303_v37  ;;  %v1968_v42 = vld [vmem:[%s2809_s1 + $0xe0] sm:$0xff]  }
   0xc   :  { %1895 = vmatprep.subr.bf16.mxu1 %v1942_v8  ;;  %511 = vmatpush1.bf16.msra.mxu0 %v1947_v12  ;;  %v1966_v41 = vld [vmem:[%s2809_s1 + $0xa8] sm:$0xff]   ;;  %v1970_v43 = vld [vmem:[%s2809_s1 + $0x160] sm:$0xff]   ;;  %v1971_v45 = vld [vmem:[%s2809_s1 + $0xd8] sm:$0xff]  }
   0xd   :  { %512 = vmatprep.subr.bf16.mxu0 %v2178_v2  ;;  %458 = vmatprep.mubr.bf16.mxu1 %v43_v25  ;;  %v1969_v44 = vld [vmem:[%s2809_s1 + $0xa0] sm:$0xff]   ;;  %v1973_v46 = vld [vmem:[%s2809_s1 + $0x158] sm:$0xff]   ;;  %v1974_v48 = vld [vmem:[%s2809_s1 + $0xd0] sm:$0xff]  }
   0xe   :  { %v1972_v47 = vld [vmem:[%s2809_s1 + $0x98] sm:$0xff]   ;;  %v1976_v49 = vld [vmem:[%s2809_s1 + $0x150] sm:$0xff]   ;;  %v2345_v50 = vld [vmem:[%s2808_s0 + $0x8] sm:$0xff] }
   0xf   :  { %1896 = vmatpush3.bf16.msra.mxu1 %v1943_v10  ;;  %v2350_v51 = vld [vmem:[%s2808_s0 + $0x20] sm:$0xff]  ;;  %v2355_v52 = vld [vmem:[%s2808_s0 + $0x10] sm:$0xff]  ;;  %v2360_v53 = vld [vmem:[%s2808_s0 + $0x28] sm:$0xff] }
  0x10   :  { %1897 = vmatprep.subr.bf16.mxu1 %v1945_v11  ;;  %513 = vmatpush1.bf16.msra.mxu0 %v1950_v15  ;;  %v33_v54 = vcombine.high %v2345_v50, %v2350_v51  ;;  %v35_v55 = vcombine.high %v2355_v52, %v2360_v53  ;;  %v1975_v56 = vld [vmem:[%s2809_s1 + $0x90] sm:$0xff]   ;;  %v1977_v57 = vld [vmem:[%s2809_s1 + $0xc8] sm:$0xff]   ;;  %v1980_v62 = vld [vmem:[%s2809_s1 + $0xc0] sm:$0xff]   ;;  %v34_v0 = vcombine.low %v2355_v52, %v2360_v53 }
  0x11   :  { %514 = vmatprep.subr.bf16.mxu0 %v2178_v2  ;;  %v1979_v58 = vld [vmem:[%s2809_s1 + $0x148] sm:$0xff]   ;;  %v1982_v63 = vld [vmem:[%s2809_s1 + $0x140] sm:$0xff]   ;;  %v32_v3 = vcombine.low %v2345_v50, %v2350_v51  ;;  %v598_v6 = vld [vmem:[%s2810_s2 + $0xf0] sm:$0x11] }
  0x12   :  { %v45_v59 = vpack.c.bf16 %v33_v54, %v33_v54  ;;  %v47_v60 = vpack.c.bf16 %v35_v55, %v35_v55  ;;  %v1978_v61 = vld [vmem:[%s2809_s1 + $0x88] sm:$0xff]   ;;  %v1981_v1 = vld [vmem:[%s2809_s1 + $0x80] sm:$0xff]   ;;  %v46_v4 = vpack.c.bf16 %v34_v0, %v34_v0  ;;  %v1785_v7 = vcombine.low %v598_v6, %v598_v6  ;;  %v599_v21 = vld [vmem:[%s2810_s2 + $0xf8] sm:$0x11] }
  0x13   :  { %1898 = vmatpush3.bf16.msra.mxu1 %v1946_v13  ;;  %v44_v5 = vpack.c.bf16 %v32_v3, %v32_v3  ;;  %v1786_v8 = vcombine.high %v598_v6, %v598_v6  ;;  %v1991_v12 = vld [vmem:[%s2810_s2 + $0xc4] ss:$24 sps:$4 sm:$0xff]   ;;  %v1989_v13 = vld [vmem:[%s2810_s2 + $0xc0] ss:$24 sps:$4 sm:$0xff]   ;;  %v1992_v15 = vld [vmem:[%s2810_s2 + $0x90] ss:$24 sps:$4 sm:$0xff]   ;;  %v1788_v23 = vcombine.high %v599_v21, %v599_v21 }
  0x14   :  { %1899 = vmatprep.subr.bf16.mxu1 %v1948_v14  ;;  %515 = vmatpush1.bf16.msra.mxu0 %v1953_v18  ;;  %v773_v11 = vand.u32 %v1785_v7, %v2400_v9  ;;  %v1994_v14 = vld [vmem:[%s2810_s2 + $0x94] ss:$24 sps:$4 sm:$0xff]   ;;  %v2003_v20 = vld [vmem:[%s2810_s2 + $0x4] ss:$24 sps:$4 sm:$0xff]   ;;  %v2015_v6 = vld [vmem:[%s2810_s2 + $0x38] ss:$24 sps:$4 sm:$0xff]  }
  0x15   :  { %516 = vmatprep.subr.bf16.mxu0 %v2178_v2  ;;  %1753 = vmatprep.mubr.msk.bf16.mxu0 %vm415_vm2, %v47_v60  ;;  %v776_v10 = vand.u32 %v1786_v8, %v2400_v9  ;;  %v2000_v18 = vld [vmem:[%s2810_s2 + $0x34] ss:$24 sps:$4 sm:$0xff]   ;;  %v782_v25 = vand.u32 %v1788_v23, %v2400_v9  ;;  %v2038_v7 = vld [vmem:[%s2811_s3 + $0x70] ss:$8 sps:$4 sm:$0xff]   ;;  %v2028_v23 = vld [vmem:[%s2810_s2 + $0xa4] ss:$24 sps:$4 sm:$0xff]  }
  0x16   :  { %v2008_v60 = vld [vmem:[%s2810_s2 + $0xcc] ss:$24 sps:$4 sm:$0xff]   ;;  %v2017_v3 = vld [vmem:[%s2810_s2 + $0x3c] ss:$24 sps:$4 sm:$0xff]  }
  0x17   :  { %1900 = vmatpush3.bf16.msra.mxu1 %v1949_v16  ;;  %v1997_v16 = vld [vmem:[%s2810_s2 + $0x64] ss:$24 sps:$4 sm:$0xff]  }
  0x18   :  { %1901 = vmatprep.subr.bf16.mxu1 %v1951_v17  ;;  %517 = vmatpush1.bf16.msra.mxu0 %v1956_v24  ;;  %v1995_v17 = vld [vmem:[%s2810_s2 + $0x60] ss:$24 sps:$4 sm:$0xff]   ;;  %v1787_v24 = vcombine.low %v599_v21, %v599_v21  ;;  %v2014_v0 = vld [vmem:[%s2810_s2 + $0x6c] ss:$24 sps:$4 sm:$0xff]  }
  0x19   :  { %518 = vmatprep.subr.bf16.mxu0 %v2178_v2  ;;  %v2043_v8 = vld [vmem:[%s2811_s3 + $0x64] ss:$8 sps:$4 sm:$0xff]   ;;  %v2047_v21 = vld [vmem:[%s2811_s3 + $0x40] ss:$8 sps:$4 sm:$0xff]  }
  0x1b   :  { %1902 = vmatpush3.bf16.msra.mxu1 %v1952_v19  ;;  %v1998_v19 = vld [vmem:[%s2810_s2 + $0x30] ss:$24 sps:$4 sm:$0xff]  }
  0x1c   :  { %1903 = vmatprep.subr.bf16.mxu1 %v1954_v22  ;;  %519 = vmatpush1.bf16.msra.mxu0 %v1961_v29  ;;  %v2001_v22 = vld [vmem:[%s2810_s2] ss:$24 sps:$4 sm:$0xff]  }
  0x1d   :  { %520 = vmatprep.subr.bf16.mxu0 %v2178_v2 }
  0x1f   :  { %1904 = vmatpush3.bf16.msra.mxu1 %v1955_v26  ;;  %v779_v26 = vand.u32 %v1787_v24, %v2400_v9  ;;  %v2050_v24 = vld [vmem:[%s2811_s3 + $0x30] ss:$8 sps:$4 sm:$0xff]  }
  0x20   :  { %1911 = vmatprep.subr.bf16.mxu1 %v1959_v28  ;;  %521 = vmatpush1.bf16.msra.mxu0 %v1964_v35 }
  0x21   :  { %526 = vmatprep.subr.bf16.mxu0 %v2178_v2 }
  0x22   :  { %459 = vmatmul.mubr.bf16.vlgmr.msra.gmra.mxu1 %v42_v31 }
  0x23   :  { %1912 = vmatpush3.bf16.msra.mxu1 %v1960_v30  ;;  %498 = vmatprep.mubr.bf16.mxu1 %v45_v59 }
  0x24   :  { %1913 = vmatprep.subr.bf16.mxu1 %v1962_v32  ;;  %527 = vmatpush2.bf16.msra.mxu0 %v424_v40 }
  0x25   :  { %528 = vmatprep.subr.bf16.mxu0 %v2178_v2 }
  0x27   :  { %1914 = vmatpush3.bf16.msra.mxu1 %v1963_v38 }
  0x28   :  { %1915 = vmatprep.subr.bf16.mxu1 %v1965_v39  ;;  %529 = vmatpush2.bf16.msra.mxu0 %v1970_v43 }
  0x29   :  { %530 = vmatprep.subr.bf16.mxu0 %v2178_v2 }
  0x2b   :  { %1916 = vmatpush3.bf16.msra.mxu1 %v1966_v41 }
  0x2c   :  { %1917 = vmatprep.subr.bf16.mxu1 %v1968_v42  ;;  %531 = vmatpush2.bf16.msra.mxu0 %v1973_v46 }
  0x2d   :  { %532 = vmatprep.subr.bf16.mxu0 %v2178_v2 }
  0x2f   :  { %1918 = vmatpush3.bf16.msra.mxu1 %v1969_v44 }
  0x30   :  { %1919 = vmatprep.subr.bf16.mxu1 %v1971_v45  ;;  %533 = vmatpush2.bf16.msra.mxu0 %v1976_v49 }
  0x31   :  { %534 = vmatprep.subr.bf16.mxu0 %v2178_v2 }
  0x33   :  { %1920 = vmatpush3.bf16.msra.mxu1 %v1972_v47 }
  0x34   :  { %1921 = vmatprep.subr.bf16.mxu1 %v1974_v48  ;;  %535 = vmatpush2.bf16.msra.mxu0 %v1979_v58 }
  0x35   :  { %536 = vmatprep.subr.bf16.mxu0 %v2178_v2 }
  0x37   :  { %1922 = vmatpush3.bf16.msra.mxu1 %v1975_v56 }
  0x38   :  { %1923 = vmatprep.subr.bf16.mxu1 %v1977_v57  ;;  %537 = vmatpush2.bf16.msra.mxu0 %v1982_v63  ;;  %v2009_v63 = vld [vmem:[%s2810_s2 + $0x98] ss:$24 sps:$4 sm:$0xff]  }
  0x3b   :  { %1924 = vmatpush3.bf16.msra.mxu1 %v1978_v61  ;;  %539 = vmatmul.mubr.bf16.vlgmr.msra.gmra.mxu0 %v46_v4  ;;  %v2006_v61 = vld [vmem:[%s2810_s2 + $0xc8] ss:$24 sps:$4 sm:$0xff]  }
  0x3c   :  { %1925 = vmatprep.subr.bf16.mxu1 %v1980_v62  ;;  %v2011_v62 = vld [vmem:[%s2810_s2 + $0x9c] ss:$24 sps:$4 sm:$0xff]   ;;  %v600_v4 = vld [vmem:[%s2810_s2 + $0x100] sm:$0x11] }
  0x3f   :  { %1926 = vmatpush3.bf16.msra.mxu1 %v1981_v1  ;;  %v2012_v1 = vld [vmem:[%s2810_s2 + $0x68] ss:$24 sps:$4 sm:$0xff]  }
  0x40   :  { %794 = vmatprep.subr.bf16.mxu1 %v776_v10  ;;  %v2020_v10 = vld [vmem:[%s2810_s2 + $0xc] ss:$24 sps:$4 sm:$0xff]  }
  0x42   :  { %499 = vmatmul.mubr.bf16.vlgmr.msra.gmra.mxu1 %v44_v5  ;;  %v2040_v5 = vld [vmem:[%s2811_s3 + $0x74] ss:$8 sps:$4 sm:$0xff]  }
  0x43   :  { %822 = vmatprep.mubr.bf16.mxu1 %v2178_v2  ;;  %795 = vmatpush1.bf16.msra.mxu1 %v773_v11  ;;  %v1790_v11 = vcombine.high %v600_v4, %v600_v4 }
  0x44   :  { %796 = vmatprep.subr.bf16.mxu1 %v1991_v12  ;;  %1526 = vmatprep.subr.bf16.mxu0 %v2040_v5  ;;  %v2041_v12 = vld [vmem:[%s2811_s3 + $0x60] ss:$8 sps:$4 sm:$0xff]   ;;  %v2095_v5 = vld [vmem:[%s2811_s3 + $0x110] ss:$8 sps:$4 sm:$0xff]  }
  0x45   :  { %1527 = vmatpush1.bf16.msra.mxu0 %v2038_v7  ;;  %v2103_v7 = vld [vmem:[%s2811_s3 + $0x104] ss:$8 sps:$4 sm:$0xff]  }
  0x46   :  { %1528 = vmatprep.subr.bf16.mxu0 %v2043_v8  ;;  %v2112_v8 = vld [vmem:[%s2811_s3 + $0x84] ss:$8 sps:$4 sm:$0xff]  }
  0x47   :  { %797 = vmatpush1.bf16.msra.mxu1 %v1989_v13  ;;  %v2046_v13 = vld [vmem:[%s2811_s3 + $0x54] ss:$8 sps:$4 sm:$0xff]  }
  0x48   :  { %798 = vmatprep.subr.bf16.mxu1 %v1994_v14  ;;  %v2018_v14 = vld [vmem:[%s2810_s2 + $0x8] ss:$24 sps:$4 sm:$0xff]  }
  0x49   :  { %1529 = vmatpush1.bf16.msra.mxu0 %v2041_v12  ;;  %v2109_v12 = vld [vmem:[%s2811_s3 + $0x1f4] ss:$8 sps:$4 sm:$0xff]  }
  0x4a   :  { %1530 = vmatprep.subr.bf16.mxu0 %v2046_v13  ;;  %v2121_v13 = vld [vmem:[%s2811_s3 + $0x274] ss:$8 sps:$4 sm:$0xff]  }
  0x4b   :  { %799 = vmatpush1.bf16.msra.mxu1 %v1992_v15  ;;  %v1789_v15 = vcombine.low %v600_v4, %v600_v4  ;;  %v2106_v4 = vld [vmem:[%s2811_s3 + $0x94] ss:$8 sps:$4 sm:$0xff]  }
  0x4c   :  { %800 = vmatprep.subr.bf16.mxu1 %v1997_v16  ;;  %v788_v16 = vand.u32 %v1790_v11, %v2400_v9  ;;  %v2110_v11 = vld [vmem:[%s2811_s3 + $0x80] ss:$8 sps:$4 sm:$0xff]  }
  0x4f   :  { %801 = vmatpush1.bf16.msra.mxu1 %v1995_v17  ;;  %v2044_v17 = vld [vmem:[%s2811_s3 + $0x50] ss:$8 sps:$4 sm:$0xff]  }
  0x50   :  { %802 = vmatprep.subr.bf16.mxu1 %v2000_v18  ;;  %v2049_v18 = vld [vmem:[%s2811_s3 + $0x44] ss:$8 sps:$4 sm:$0xff]   ;;  %1531 = vmatpush1.bf16.msra.mxu0 %v2044_v17  ;;  %v2118_v17 = vld [vmem:[%s2811_s3 + $0x1d4] ss:$8 sps:$4 sm:$0xff]  }
  0x51   :  { %1532 = vmatprep.subr.bf16.mxu0 %v2049_v18  ;;  %v2116_v18 = vld [vmem:[%s2811_s3 + $0x1d0] ss:$8 sps:$4 sm:$0xff]  }
  0x53   :  { %803 = vmatpush1.bf16.msra.mxu1 %v1998_v19  ;;  %v785_v19 = vand.u32 %v1789_v15, %v2400_v9  ;;  %v2023_v9 = vld [vmem:[%s2810_s2 + $0xd0] ss:$24 sps:$4 sm:$0xff]   ;;  %v2115_v15 = vld [vmem:[%s2811_s3 + $0x1e4] ss:$8 sps:$4 sm:$0xff]  }
  0x54   :  { %804 = vmatprep.subr.bf16.mxu1 %v2003_v20  ;;  %v2025_v20 = vld [vmem:[%s2810_s2 + $0xd4] ss:$24 sps:$4 sm:$0xff]   ;;  %1533 = vmatpush1.bf16.msra.mxu0 %v2047_v21 }
  0x55   :  { %v2130_v21 = vld [vmem:[%s2811_s3 + $0x1b4] ss:$8 sps:$4 sm:$0xff]  }
  0x57   :  { %805 = vmatpush1.bf16.msra.mxu1 %v2001_v22  ;;  %v2052_v22 = vld [vmem:[%s2811_s3 + $0x34] ss:$8 sps:$4 sm:$0xff]  }
  0x58   :  { %835 = vmatprep.subr.bf16.mxu1 %v782_v25  ;;  %1534 = vmatprep.subr.bf16.mxu0 %v2052_v22  ;;  %v2055_v25 = vld [vmem:[%s2811_s3 + $0x24] ss:$8 sps:$4 sm:$0xff]   ;;  %v2128_v22 = vld [vmem:[%s2811_s3 + $0x1b0] ss:$8 sps:$4 sm:$0xff]  }
  0x59   :  { %1535 = vmatpush1.bf16.msra.mxu0 %v2050_v24  ;;  %v2142_v24 = vld [vmem:[%s2811_s3 + $0x194] ss:$8 sps:$4 sm:$0xff]  }
  0x5a   :  { %1536 = vmatprep.subr.bf16.mxu0 %v2055_v25  ;;  %v2140_v25 = vld [vmem:[%s2811_s3 + $0x190] ss:$8 sps:$4 sm:$0xff]  }
  0xe2   :  { %v1905_v27 = vpop.f32.mrf.mxu1 }
  0xe4   :  { %v1906_v28 = vpop.f32.mrf.mxu1 }
  0xe5   :  { %v1907_v36 = vadd.f32 %v1906_v28, %v1905_v27  ;;  %v2053_v27 = vld [vmem:[%s2811_s3 + $0x20] ss:$8 sps:$4 sm:$0xff]   ;;  %v2058_v28 = vld [vmem:[%s2811_s3 + $0x14] ss:$8 sps:$4 sm:$0xff]  }
  0xe6   :  { %v1908_v29 = vpop.f32.mrf.mxu1  ;;  %1537 = vmatpush1.bf16.msra.mxu0 %v2053_v27 }
  0xe7   :  { %v2029_v29 = vld [vmem:[%s2810_s2 + $0x70] ss:$24 sps:$4 sm:$0xff]   ;;  %1538 = vmatprep.subr.bf16.mxu0 %v2058_v28 }
  0xe8   :  { %v1909_v30 = vpop.f32.mrf.mxu1 }
  0xe9   :  { %v2034_v30 = vld [vmem:[%s2810_s2 + $0x44] ss:$24 sps:$4 sm:$0xff]  }
  0xfb   :  { %v540_v31 = vpop.f32.mrf.mxu0 }
  0xfd   :  { %v542_v32 = vpop.f32.mrf.mxu0 }
  0xfe   :  { %v2064_v32 = vld [vmem:[%s2811_s3 + $0x4] ss:$8 sps:$4 sm:$0xff]  }
  0xff   :  { %v543_v34 = vpop.f32.mrf.mxu0 }
 0x100   :  { %v2037_v34 = vld [vmem:[%s2810_s2 + $0x14] ss:$24 sps:$4 sm:$0xff]  }
 0x101   :  { %v544_v39 = vpop.f32.mrf.mxu0 }
 0x102   :  { %v1927_v33 = vpop.f32.mrf.mxu1  ;;  %v2061_v39 = vld [vmem:[%s2811_s3 + $0x174] ss:$8 sps:$4 sm:$0xff]  }
 0x104   :  { %v1928_v35 = vpop.f32.mrf.mxu1 }
 0x105   :  { %v1929_v38 = vadd.f32 %v1928_v35, %v1927_v33  ;;  %v2032_v33 = vld [vmem:[%s2810_s2 + $0x40] ss:$24 sps:$4 sm:$0xff]  }
 0x106   :  { %v1930_v40 = vpop.f32.mrf.mxu1  ;;  %v2062_v35 = vld [vmem:[%s2811_s3] ss:$8 sps:$4 sm:$0xff]  }
 0x107   :  { %v501_v41 = vadd.f32 %v1929_v38, %v1907_v36  ;;  %v2070_v36 = vld [vmem:[%s2811_s3 + $0xf4] ss:$8 sps:$4 sm:$0xff]   ;;  %v2035_v38 = vld [vmem:[%s2810_s2 + $0x10] ss:$24 sps:$4 sm:$0xff]  }
 0x108   :  { %v1931_v42 = vpop.f32.mrf.mxu1  ;;  %v2068_v40 = vld [vmem:[%s2811_s3 + $0xf0] ss:$8 sps:$4 sm:$0xff]  }
 0x109   :  { %v541_v43 = vadd.f32 %v540_v31, %v501_v41  ;;  %v2056_v31 = vld [vmem:[%s2811_s3 + $0x10] ss:$8 sps:$4 sm:$0xff]   ;;  %v2076_v41 = vld [vmem:[%s2811_s3 + $0xe4] ss:$8 sps:$4 sm:$0xff]  }
 0x10a   :  { %1539 = vmatpush1.bf16.msra.mxu0 %v2056_v31  ;;  %v2059_v42 = vld [vmem:[%s2811_s3 + $0x170] ss:$8 sps:$4 sm:$0xff]  }
 0x10b   :  { %v550_v44 = vadd.f32 1.0, %v541_v43  ;;  %v552_v45 = vsub.f32 1.0, %v541_v43  ;;  %v547_v46 = vsub.f32 2.0, %v541_v43  ;;  %v546_v49 = vmax.f32 %v541_v43, 0.0  ;;  %1540 = vmatprep.subr.bf16.mxu0 %v2064_v32  ;;  %v2067_v43 = vld [vmem:[%s2811_s3 + $0x164] ss:$8 sps:$4 sm:$0xff]  }
 0x10c   :  { %v2176_v32 = vld [vmem:[%s2808_s0] sm:$0xff] }
 0x10d   :  { %v551_v47 = vmax.f32 %v550_v44, 0.0  ;;  %v553_v48 = vmax.f32 %v552_v45, 0.0  ;;  %v548_v54 = vmax.f32 %v547_v46, 0.0  ;;  %v2074_v44 = vld [vmem:[%s2811_s3 + $0xe0] ss:$8 sps:$4 sm:$0xff]  }
 0x10e   :  { %1541 = vmatpush1.bf16.msra.mxu0 %v2062_v35  ;;  %v2082_v45 = vld [vmem:[%s2811_s3 + $0xd4] ss:$8 sps:$4 sm:$0xff]   ;;  %v2065_v46 = vld [vmem:[%s2811_s3 + $0x160] ss:$8 sps:$4 sm:$0xff]  }
 0x10f   :  { %v554_v55 = vmin.f32 %v551_v47, %v553_v48  ;;  %v549_v56 = vmin.f32 %v546_v49, %v548_v54  ;;  %1542 = vmatprep.subr.bf16.mxu0 %v2070_v36  ;;  %v2073_v47 = vld [vmem:[%s2811_s3 + $0x154] ss:$8 sps:$4 sm:$0xff]   ;;  %v2080_v48 = vld [vmem:[%s2811_s3 + $0xd0] ss:$8 sps:$4 sm:$0xff]   ;;  %v2088_v49 = vld [vmem:[%s2811_s3 + $0xc4] ss:$8 sps:$4 sm:$0xff]  }
 0x110   :  { %v2071_v54 = vld [vmem:[%s2811_s3 + $0x150] ss:$8 sps:$4 sm:$0xff]  }
 0x111   :  { %v564_v57 = vsel %vm555_vm4, %v554_v55, -inf  ;;  %v556_v58 = vsel %vm555_vm4, %v549_v56, 0.0  ;;  %v2441_v59 = vpack.c.bf16 %v549_v56, %v549_v56  ;;  %v2079_v55 = vld [vmem:[%s2811_s3 + $0x144] ss:$8 sps:$4 sm:$0xff]   ;;  %v2086_v56 = vld [vmem:[%s2811_s3 + $0xc0] ss:$8 sps:$4 sm:$0xff]  }
 0x112   :  { %565 = vmax.xlane.f32.xlu1 %v564_v57  ;;  %557 = vadd.xlane.f32.xlu0 %v556_v58  ;;  %v2094_v57 = vld [vmem:[%s2811_s3 + $0xb4] ss:$8 sps:$4 sm:$0xff]   ;;  %v2077_v58 = vld [vmem:[%s2811_s3 + $0x140] ss:$8 sps:$4 sm:$0xff]  }
 0x113   :  { %1791 = vmatmul.mubr.msk.bf16.vlgmr.msra.gmra.mxu1 %vm555_vm4, %v2441_v59  ;;  %1543 = vmatpush2.bf16.msra.mxu0 %v2068_v40 }
 0x114   :  { %836 = vmatpush1.bf16.msra.mxu1 %v779_v26  ;;  %863 = vmatprep.mubr.bf16.mxu1 %v2178_v2  ;;  %v2031_v26 = vld [vmem:[%s2810_s2 + $0x74] ss:$24 sps:$4 sm:$0xff]  }
 0x115   :  { %837 = vmatprep.subr.bf16.mxu1 %v2008_v60  ;;  %1544 = vmatprep.subr.bf16.mxu0 %v2076_v41  ;;  %v2092_v60 = vld [vmem:[%s2811_s3 + $0xb0] ss:$8 sps:$4 sm:$0xff]  }
 0x117   :  { %1545 = vmatpush2.bf16.msra.mxu0 %v2074_v44  ;;  %v2119_v44 = vld [vmem:[%s2811_s3 + $0x270] ss:$8 sps:$4 sm:$0xff]  }
 0x118   :  { %838 = vmatpush1.bf16.msra.mxu1 %v2006_v61  ;;  %1546 = vmatprep.subr.bf16.mxu0 %v2082_v45  ;;  %v2083_v61 = vld [vmem:[%s2811_s3 + $0x130] ss:$8 sps:$4 sm:$0xff]   ;;  %v2127_v45 = vld [vmem:[%s2811_s3 + $0x264] ss:$8 sps:$4 sm:$0xff]  }
 0x119   :  { %839 = vmatprep.subr.bf16.mxu1 %v2011_v62  ;;  %v2091_v62 = vld [vmem:[%s2811_s3 + $0x124] ss:$8 sps:$4 sm:$0xff]  }
 0x11b   :  { %1547 = vmatpush2.bf16.msra.mxu0 %v2080_v48  ;;  %v2131_v48 = vld [vmem:[%s2811_s3 + $0x250] ss:$8 sps:$4 sm:$0xff]  }
 0x11c   :  { %840 = vmatpush1.bf16.msra.mxu1 %v2009_v63  ;;  %1548 = vmatprep.subr.bf16.mxu0 %v2088_v49  ;;  %v2098_v63 = vld [vmem:[%s2811_s3 + $0xa0] ss:$8 sps:$4 sm:$0xff]   ;;  %v2139_v49 = vld [vmem:[%s2811_s3 + $0x244] ss:$8 sps:$4 sm:$0xff]  }
 0x11d   :  { %841 = vmatprep.subr.bf16.mxu1 %v2014_v0  ;;  %v2100_v0 = vld [vmem:[%s2811_s3 + $0xa4] ss:$8 sps:$4 sm:$0xff]  }
 0x11f   :  { %1549 = vmatpush2.bf16.msra.mxu0 %v2086_v56  ;;  %v2145_v56 = vld [vmem:[%s2811_s3 + $0x234] ss:$8 sps:$4 sm:$0xff]  }
 0x120   :  { %842 = vmatpush1.bf16.msra.mxu1 %v2012_v1  ;;  %1550 = vmatprep.subr.bf16.mxu0 %v2094_v57  ;;  %v2089_v1 = vld [vmem:[%s2811_s3 + $0x120] ss:$8 sps:$4 sm:$0xff]  }
 0x121   :  { %843 = vmatprep.subr.bf16.mxu1 %v2017_v3  ;;  %v2097_v3 = vld [vmem:[%s2811_s3 + $0x114] ss:$8 sps:$4 sm:$0xff]  }
 0x123   :  { %1551 = vmatpush2.bf16.msra.mxu0 %v2092_v60  ;;  %v2143_v60 = vld [vmem:[%s2811_s3 + $0x230] ss:$8 sps:$4 sm:$0xff]  }
 0x124   :  { %844 = vmatpush1.bf16.msra.mxu1 %v2015_v6  ;;  %1552 = vmatprep.subr.bf16.mxu0 %v2100_v0  ;;  %v2104_v6 = vld [vmem:[%s2811_s3 + $0x90] ss:$8 sps:$4 sm:$0xff]  }
 0x125   :  { %845 = vmatprep.subr.bf16.mxu1 %v2020_v10  ;;  %v2101_v10 = vld [vmem:[%s2811_s3 + $0x100] ss:$8 sps:$4 sm:$0xff]  }
 0x127   :  { %1553 = vmatpush2.bf16.msra.mxu0 %v2098_v63 }
 0x128   :  { %846 = vmatpush1.bf16.msra.mxu1 %v2018_v14  ;;  %1554 = vmatprep.subr.bf16.mxu0 %v2106_v4  ;;  %v2107_v14 = vld [vmem:[%s2811_s3 + $0x1f0] ss:$8 sps:$4 sm:$0xff]  }
 0x129   :  { %876 = vmatprep.subr.bf16.mxu1 %v788_v16  ;;  %v2113_v16 = vld [vmem:[%s2811_s3 + $0x1e0] ss:$8 sps:$4 sm:$0xff]  }
 0x12b   :  { %1792 = vmatmul.mubr.msk.bf16.vlgmr.msra.gmra.mxu1 %vm555_vm4, %v2441_v59  ;;  %1555 = vmatpush2.bf16.msra.mxu0 %v2104_v6  ;;  %v2154_v6 = vld [vmem:[%s2811_s3 + $0x214] ss:$8 sps:$4 sm:$0xff]  }
 0x12c   :  { %877 = vmatpush1.bf16.msra.mxu1 %v785_v19  ;;  %904 = vmatprep.mubr.bf16.mxu1 %v2178_v2  ;;  %v2026_v2 = vld [vmem:[%s2810_s2 + $0xa0] ss:$24 sps:$4 sm:$0xff]   ;;  %v2124_v19 = vld [vmem:[%s2811_s3 + $0x1c4] ss:$8 sps:$4 sm:$0xff]  }
 0x12d   :  { %878 = vmatprep.subr.bf16.mxu1 %v2025_v20  ;;  %1556 = vmatprep.subr.bf16.mxu0 %v2112_v8  ;;  %v2122_v20 = vld [vmem:[%s2811_s3 + $0x1c0] ss:$8 sps:$4 sm:$0xff]  }
 0x12f   :  { %1557 = vmatpush2.bf16.msra.mxu0 %v2110_v11  ;;  %v2157_v11 = vld [vmem:[%s2811_s3 + $0x204] ss:$8 sps:$4 sm:$0xff]  }
 0x130   :  { %879 = vmatpush1.bf16.msra.mxu1 %v2023_v9  ;;  %1608 = vmatprep.subr.bf16.mxu0 %v2121_v13  ;;  %v2136_v9 = vld [vmem:[%s2811_s3 + $0x1a4] ss:$8 sps:$4 sm:$0xff]   ;;  %v2155_v13 = vld [vmem:[%s2811_s3 + $0x200] ss:$8 sps:$4 sm:$0xff]  }
 0x131   :  { %880 = vmatprep.subr.bf16.mxu1 %v2028_v23  ;;  %v2134_v23 = vld [vmem:[%s2811_s3 + $0x1a0] ss:$8 sps:$4 sm:$0xff]  }
 0x134   :  { %881 = vmatpush1.bf16.msra.mxu1 %v2026_v2  ;;  %v2148_v2 = vld [vmem:[%s2811_s3 + $0x184] ss:$8 sps:$4 sm:$0xff]  }
 0x135   :  { %882 = vmatprep.subr.bf16.mxu1 %v2031_v26  ;;  %v2146_v26 = vld [vmem:[%s2811_s3 + $0x180] ss:$8 sps:$4 sm:$0xff]  }
 0x138   :  { %883 = vmatpush1.bf16.msra.mxu1 %v2029_v29 }
 0x139   :  { %884 = vmatprep.subr.bf16.mxu1 %v2034_v30 }
 0x13c   :  { %885 = vmatpush1.bf16.msra.mxu1 %v2032_v33 }
 0x13d   :  { %886 = vmatprep.subr.bf16.mxu1 %v2037_v34  ;;  %v2177_v34 = vld [vmem:[%s2808_s0 + $0x18] sm:$0xff] }
 0x140   :  { %887 = vmatpush1.bf16.msra.mxu1 %v2035_v38 }
 0x141   :  { %1567 = vmatprep.subr.bf16.mxu1 %v2061_v39 }
 0x143   :  { %1793 = vmatmul.mubr.msk.bf16.vlgmr.msra.gmra.mxu1 %vm555_vm4, %v2441_v59  ;;  %v2085_v59 = vld [vmem:[%s2811_s3 + $0x134] ss:$8 sps:$4 sm:$0xff]  }
 0x144   :  { %1568 = vmatpush1.bf16.msra.mxu1 %v2059_v42 }
 0x145   :  { %1569 = vmatprep.subr.bf16.mxu1 %v2067_v43 }
 0x148   :  { %1570 = vmatpush1.bf16.msra.mxu1 %v2065_v46  ;;  %v2125_v46 = vld [vmem:[%s2811_s3 + $0x260] ss:$8 sps:$4 sm:$0xff]  }
 0x149   :  { %1571 = vmatprep.subr.bf16.mxu1 %v2073_v47  ;;  %v2133_v47 = vld [vmem:[%s2811_s3 + $0x254] ss:$8 sps:$4 sm:$0xff]  }
 0x14c   :  { %1572 = vmatpush1.bf16.msra.mxu1 %v2071_v54  ;;  %v2137_v54 = vld [vmem:[%s2811_s3 + $0x240] ss:$8 sps:$4 sm:$0xff]  }
 0x14d   :  { %1573 = vmatprep.subr.bf16.mxu1 %v2079_v55 }
 0x150   :  { %1574 = vmatpush1.bf16.msra.mxu1 %v2077_v58 }
 0x151   :  { %1575 = vmatprep.subr.bf16.mxu1 %v2085_v59 }
 0x154   :  { %1576 = vmatpush1.bf16.msra.mxu1 %v2083_v61 }
 0x155   :  { %1577 = vmatprep.subr.bf16.mxu1 %v2091_v62  ;;  %v2151_v62 = vld [vmem:[%s2811_s3 + $0x224] ss:$8 sps:$4 sm:$0xff]  }
 0x158   :  { %1578 = vmatpush1.bf16.msra.mxu1 %v2089_v1 }
 0x159   :  { %1579 = vmatprep.subr.bf16.mxu1 %v2097_v3 }
 0x15c   :  { %1580 = vmatpush1.bf16.msra.mxu1 %v2095_v5  ;;  %v2149_v5 = vld [vmem:[%s2811_s3 + $0x220] ss:$8 sps:$4 sm:$0xff]  }
 0x15d   :  { %1581 = vmatprep.subr.bf16.mxu1 %v2103_v7 }
 0x160   :  { %1582 = vmatpush1.bf16.msra.mxu1 %v2101_v10 }
 0x161   :  { %1583 = vmatprep.subr.bf16.mxu1 %v2109_v12  ;;  %v2160_v12 = vld [vmem:[%s2811_s3 + $0x2d4] ss:$8 sps:$4 sm:$0x1f]  }
 0x164   :  { %1584 = vmatpush2.bf16.msra.mxu1 %v2107_v14  ;;  %v2158_v14 = vld [vmem:[%s2811_s3 + $0x2d0] ss:$8 sps:$4 sm:$0x1f]  }
 0x165   :  { %1585 = vmatprep.subr.bf16.mxu1 %v2115_v15  ;;  %v1524_v15 = vand.u32 %v2160_v12, %v2303_v37 }
 0x168   :  { %1586 = vmatpush2.bf16.msra.mxu1 %v2113_v16  ;;  %v1521_v16 = vand.u32 %v2158_v14, %v2303_v37  ;;  %v2164_v37 = vld [vmem:[%s2811_s3 + $0x2b0] ss:$8 sps:$4 sm:$0xff]  }
 0x169   :  { %1587 = vmatprep.subr.bf16.mxu1 %v2118_v17  ;;  %v2163_v17 = vld [vmem:[%s2811_s3 + $0x2c4] ss:$8 sps:$4 sm:$0xff]  }
 0x16c   :  { %1588 = vmatpush2.bf16.msra.mxu1 %v2116_v18  ;;  %v2161_v18 = vld [vmem:[%s2811_s3 + $0x2c0] ss:$8 sps:$4 sm:$0xff]  }
 0x16d   :  { %1589 = vmatprep.subr.bf16.mxu1 %v2124_v19 }
 0x170   :  { %1590 = vmatpush2.bf16.msra.mxu1 %v2122_v20  ;;  %v2166_v20 = vld [vmem:[%s2811_s3 + $0x2b4] ss:$8 sps:$4 sm:$0xff]  }
 0x171   :  { %1591 = vmatprep.subr.bf16.mxu1 %v2130_v21 }
 0x174   :  { %1592 = vmatpush2.bf16.msra.mxu1 %v2128_v22 }
 0x175   :  { %1593 = vmatprep.subr.bf16.mxu1 %v2136_v9 }
 0x178   :  { %1594 = vmatpush2.bf16.msra.mxu1 %v2134_v23 }
 0x179   :  { %1595 = vmatprep.subr.bf16.mxu1 %v2142_v24  ;;  %v2169_v24 = vld [vmem:[%s2811_s3 + $0x2a4] ss:$8 sps:$4 sm:$0xff]  }
 0x17c   :  { %1596 = vmatpush2.bf16.msra.mxu1 %v2140_v25 }
 0x17d   :  { %1597 = vmatprep.subr.bf16.mxu1 %v2148_v2 }
 0x180   :  { %1598 = vmatpush2.bf16.msra.mxu1 %v2146_v26 }
 0x1d3   :  { %v824_v27 = vpop.f32.mrf.mxu1 }
 0x1d5   :  { %v826_v28 = vpop.f32.mrf.mxu1 }
 0x1d6   :  { %v919_v29 = vcombine.low %v824_v27, %v826_v28  ;;  %v920_v30 = vcombine.high %v824_v27, %v826_v28 }
 0x1d7   :  { %v828_v31 = vpop.f32.mrf.mxu1 }
 0x1d8   :  { %v931_v33 = vmin.f32 %v2176_v32, %v919_v29  ;;  %v934_v35 = vmin.f32 %v2177_v34, %v920_v30  ;;  %v2167_v29 = vld [vmem:[%s2811_s3 + $0x2a0] ss:$8 sps:$4 sm:$0xff]   ;;  %v2172_v30 = vld [vmem:[%s2811_s3 + $0x294] ss:$8 sps:$4 sm:$0xff]  }
 0x1d9   :  { %v829_v36 = vpop.f32.mrf.mxu1 }
 0x1da   :  { %v937_v38 = vmax.f32 %v931_v33, 0.0  ;;  %v940_v39 = vmax.f32 %v934_v35, 0.0  ;;  %v2173_v33 = vld [vmem:[%s2811_s3 + $0x280] ss:$8 sps:$4 sm:$0xff]  }
 0x1dc   :  { %v949_v40 = vcombine.low %v937_v38, %v940_v39  ;;  %v950_v41 = vcombine.high %v937_v38, %v940_v39 }
 0x1de   :  { %v961_v42 = vpack.c.bf16 %v949_v40, %v949_v40  ;;  %v962_v43 = vpack.c.bf16 %v950_v41, %v950_v41 }
 0x1e0   :  { %1558 = vmatprep.mubr.bf16.mxu0 %v962_v43 }
 0x1e1   :  { %1559 = vmatmul.mubr.bf16.vlgmr.msra.gmra.mxu0 %v961_v42 }
 0x1e2   :  { %1609 = vmatpush1.bf16.msra.mxu0 %v2119_v44 }
 0x1e3   :  { %1610 = vmatprep.subr.bf16.mxu0 %v2127_v45 }
 0x1e6   :  { %1611 = vmatpush1.bf16.msra.mxu0 %v2125_v46 }
 0x1e7   :  { %1612 = vmatprep.subr.bf16.mxu0 %v2133_v47 }
 0x1ea   :  { %1613 = vmatpush1.bf16.msra.mxu0 %v2131_v48 }
 0x1eb   :  { %v865_v55 = vpop.f32.mrf.mxu1  ;;  %1614 = vmatprep.subr.bf16.mxu0 %v2139_v49 }
 0x1ed   :  { %v867_v57 = vpop.f32.mrf.mxu1 }
 0x1ee   :  { %v921_v58 = vcombine.low %v865_v55, %v867_v57  ;;  %v922_v59 = vcombine.high %v865_v55, %v867_v57  ;;  %1615 = vmatpush1.bf16.msra.mxu0 %v2137_v54 }
 0x1ef   :  { %v869_v61 = vpop.f32.mrf.mxu1  ;;  %1616 = vmatprep.subr.bf16.mxu0 %v2145_v56 }
 0x1f0   :  { %v932_v63 = vmin.f32 %v2345_v50, %v921_v58  ;;  %v935_v0 = vmin.f32 %v2350_v51, %v922_v59  ;;  %v2152_v51 = vld [vmem:[%s2811_s3 + $0x210] ss:$8 sps:$4 sm:$0xff]  }
 0x1f1   :  { %v870_v1 = vpop.f32.mrf.mxu1 }
 0x1f2   :  { %v938_v3 = vmax.f32 %v932_v63, 0.0  ;;  %v941_v4 = vmax.f32 %v935_v0, 0.0  ;;  %1617 = vmatpush1.bf16.msra.mxu0 %v2143_v60  ;;  %v558_v63 = vpop.xlane.xlu0 %557 }
 0x1f3   :  { %1618 = vmatprep.subr.bf16.mxu0 %v2151_v62  ;;  %v1754_v0 = vadd.f32 -80.0, %v558_v63  ;;  %v561_v1 = vsub.f32 82.0, %v558_v63 }
 0x1f4   :  { %v951_v7 = vcombine.low %v938_v3, %v941_v4  ;;  %v952_v8 = vcombine.high %v938_v3, %v941_v4 }
 0x1f5   :  { %v560_v3 = vmax.f32 %v1754_v0, 0.0  ;;  %v562_v4 = vmax.f32 %v561_v1, 0.0 }
 0x1f6   :  { %v963_v10 = vpack.c.bf16 %v951_v7, %v951_v7  ;;  %1619 = vmatpush1.bf16.msra.mxu0 %v2149_v5  ;;  %v964_v50 = vpack.c.bf16 %v952_v8, %v952_v8 }
 0x1f7   :  { %1620 = vmatprep.subr.bf16.mxu0 %v2154_v6  ;;  %v563_v7 = vmin.f32 %v560_v3, %v562_v4 }
 0x1f8   :  { %1599 = vmatprep.mubr.bf16.mxu1 %v964_v50 }
 0x1f9   :  { %1600 = vmatmul.mubr.bf16.vlgmr.msra.gmra.mxu1 %v963_v10  ;;  %v566_v10 = vpop.xlane.xlu1 %565 }
 0x1fa   :  { %1621 = vmatpush1.bf16.msra.mxu0 %v2152_v51 }
 0x1fb   :  { %1622 = vmatprep.subr.bf16.mxu0 %v2157_v11 }
 0x1fe   :  { %1623 = vmatpush1.bf16.msra.mxu0 %v2155_v13 }
 0x1ff   :  { %1628 = vmatprep.subr.bf16.mxu0 %v1524_v15 }
 0x202   :  { %1629 = vmatpush2.bf16.msra.mxu0 %v1521_v16 }
 0x203   :  { %v906_v19 = vpop.f32.mrf.mxu1  ;;  %1630 = vmatprep.subr.bf16.mxu0 %v2163_v17 }
 0x205   :  { %v908_v21 = vpop.f32.mrf.mxu1 }
 0x206   :  { %v923_v22 = vcombine.low %v906_v19, %v908_v21  ;;  %v924_v9 = vcombine.high %v906_v19, %v908_v21  ;;  %1631 = vmatpush2.bf16.msra.mxu0 %v2161_v18 }
 0x207   :  { %v910_v23 = vpop.f32.mrf.mxu1  ;;  %1632 = vmatprep.subr.bf16.mxu0 %v2166_v20 }
 0x208   :  { %v933_v25 = vmin.f32 %v2355_v52, %v923_v22  ;;  %v936_v2 = vmin.f32 %v2360_v53, %v924_v9  ;;  %v2170_v52 = vld [vmem:[%s2811_s3 + $0x290] ss:$8 sps:$4 sm:$0xff]   ;;  %v2175_v53 = vld [vmem:[%s2811_s3 + $0x284] ss:$8 sps:$4 sm:$0xff]  }
 0x209   :  { %v911_v26 = vpop.f32.mrf.mxu1 }
 0x20a   :  { %v939_v27 = vmax.f32 %v933_v25, 0.0  ;;  %v942_v28 = vmax.f32 %v936_v2, 0.0  ;;  %1633 = vmatpush2.bf16.msra.mxu0 %v2164_v37 }
 0x20b   :  { %1634 = vmatprep.subr.bf16.mxu0 %v2169_v24 }
 0x20c   :  { %v954_v31 = vcombine.high %v939_v27, %v942_v28  ;;  %v953_v34 = vcombine.low %v939_v27, %v942_v28 }
 0x20e   :  { %v966_v32 = vpack.c.bf16 %v954_v31, %v954_v31  ;;  %1635 = vmatpush2.bf16.msra.mxu0 %v2167_v29  ;;  %v965_v35 = vpack.c.bf16 %v953_v34, %v953_v34 }
 0x20f   :  { %1636 = vmatprep.subr.bf16.mxu0 %v2172_v30 }
 0x210   :  { %1886 = vmatprep.mubr.msk.bf16.mxu0 %vm415_vm2, %v966_v32 }
 0x212   :  { %1637 = vmatpush2.bf16.msra.mxu0 %v2170_v52 }
 0x213   :  { %1638 = vmatprep.subr.bf16.mxu0 %v2175_v53 }
 0x216   :  { %1639 = vmatpush2.bf16.msra.mxu0 %v2173_v33 }
 0x219   :  { %1641 = vmatmul.mubr.bf16.vlgmr.msra.gmra.mxu0 %v965_v35 }
 0x2a1   :  { %v1560_v36 = vpop.f32.mrf.mxu0 }
 0x2a3   :  { %v1562_v38 = vpop.f32.mrf.mxu0 }
 0x2a5   :  { %v1564_v39 = vpop.f32.mrf.mxu0 }
 0x2a7   :  { %v1565_v40 = vpop.f32.mrf.mxu0 }
 0x2b9   :  { %v1601_v41 = vpop.f32.mrf.mxu1 }
 0x2ba   :  { %v1602_v45 = vadd.f32 %v1601_v41, %v1560_v36 }
 0x2bb   :  { %v1603_v42 = vpop.f32.mrf.mxu1 }
 0x2bc   :  { %v1604_v47 = vadd.f32 %v1603_v42, %v1562_v38 }
 0x2bd   :  { %v1605_v43 = vpop.f32.mrf.mxu1 }
 0x2bf   :  { %v1606_v44 = vpop.f32.mrf.mxu1 }
 0x2d9   :  { %v1642_v46 = vpop.f32.mrf.mxu0 }
 0x2da   :  { %v1643_v48 = vadd.f32 %v1642_v46, %v1602_v45 }
 0x2db   :  { %v1644_v49 = vpop.f32.mrf.mxu0 }
 0x2dc   :  { %v1645_v54 = vadd.f32 %v1644_v49, %v1604_v47  ;;  %v1887_v55 = vadd.f32 -1.0, %v1643_v48 }
 0x2dd   :  { %v1646_v56 = vpop.f32.mrf.mxu0 }
 0x2de   :  { %v1888_v57 = vadd.f32 -1.0, %v1645_v54  ;;  %v1651_v60 = vmax.f32 %v1887_v55, 0.0 }
 0x2df   :  { %v1647_v58 = vpop.f32.mrf.mxu0 }
 0x2e0   :  { %v1652_v59 = vmax.f32 %v1888_v57, 0.0 }
 0x2e2   :  { %v1654_v61 = vsel %vm1653_vm5, %v1652_v59, -inf }
 0x2e3   :  { %v1655_v62 = vmax.f32 %v1651_v60, %v1654_v61 }
 0x2e5   :  { %1656 = vmax.xlane.f32.xlu0 %v1655_v62 }
 0x36e   :  { %v1657_v5 = vpop.xlane.xlu0 %1656 }
 0x36f   :  { %v1658_v6 = vmin.f32 %v1657_v5, 1.0 }
 0x371   :  { %v1660_v8 = vsub.f32 1.0, %v1658_v6  ;;  %v1659_v50 = vmax.f32 %v566_v10, %v1658_v6 }
 0x373   :  { %v1661_v51 = vmin.f32 %v563_v7, %v1660_v8 }
 0x375   :  { %v1663_v11 = vsel %vm1662_vm6, %v1661_v51, %v1659_v50 }
 0x376   :  { %1665 = vst.msk [vmem:[#allocation2] sm:$0xff] %vm1664_vm7, %v1663_v11 }
 0x37d   :  { %v1684_v12 = vld [vmem:[#allocation2] sm:$0xf] }
 0x37e   :  { %1685 = vst [vmem:[%s2812_s4] sm:$0xf] %v1684_v12 }

</bundles_post_ra>
